<compile_context>
chip_gen: v5e
topology: v5e:2x2
jax: 0.10.0
libtpu: 0.0.40
codegen_flags: <defaults>
</compile_context>

<pallas_src>
import functools

import jax
import jax.numpy as jnp
from jax.experimental import pallas as pl
from jax.experimental.pallas import tpu as pltpu


# ----------------------------- Pallas kernel ------------------------------ #
def _dense_conv_kernel(x_ref, a_ref, bias_ref, mask_ref, out_ref):
    """One (batch, row-block) step of reflect-pad conv + bias + ReLU + concat.

    x_ref   : (1, tile_h, K)   K = kh*Wp*Cin  -- kh shifted padded rows, lane-stacked
    a_ref   : (K, Wcat)        banded block-Toeplitz weights; identity passthrough
                               of x folded into the center-tap rows
    bias_ref: (1, Wcat)        bias in conv columns, 0 in passthrough columns
    mask_ref: (1, Wcat)        1.0 in conv columns, 0.0 in passthrough columns
    out_ref : (1, tile_h, Wcat) concatenated output rows (lane-dense slab)
    """
    rows = x_ref[0, :, :]                                  # (tile_h, K)
    acc = jnp.dot(rows, a_ref[...], preferred_element_type=jnp.float32)
    conv = jnp.maximum(acc + bias_ref[...], 0.0)           # bias+ReLU (conv columns)
    # Passthrough columns keep acc (== x exactly, f32 identity contraction).
    out_ref[0, :, :] = jnp.where(mask_ref[...] > 0.5, conv, acc).astype(out_ref.dtype)


# ------------------------------ Module glue -------------------------------- #
def _pick_tile_h(h_out, per_row_bytes, budget_bytes=8 << 20):
    """Largest row-block (full height preferred) whose double-buffered blocks fit."""
    cands = sorted({h_out, *[t for t in range(8, h_out, 8) if h_out % t == 0]},
                   reverse=True)
    for t in cands:
        if 2 * t * per_row_bytes <= budget_bytes:
            return t
    return cands[-1]


def dense_conv2d_forward(x_nchw, weight, bias, *, kernel_size, stride, tile_h=None):
    """DenseConv2d forward: cat([x, relu(conv2d(reflect_pad(x)))], channel)."""
    N, Cin, H, W = x_nchw.shape
    Cout = weight.shape[0]
    kh = kw = kernel_size
    if stride != 1 or kernel_size % 2 != 1:
        # The PyTorch module's channel concat implicitly requires Hout==H, Wout==W.
        raise ValueError("DenseConv2d requires stride=1 and odd kernel_size")
    pad = kernel_size // 2
    if H <= pad or W <= pad:
        raise ValueError("reflection padding requires H > pad and W > pad")
    Hout, Wout = H, W
    Hp, Wp = H + 2 * pad, W + 2 * pad
    Ccat = Cin + Cout
    Wcat = Wout * Ccat
    K = kh * Wp * Cin

    # --- input glue: NCHW -> NHWC, reflection pad, stack kh row-shifts into lanes ---
    x_nhwc = jnp.transpose(x_nchw.astype(jnp.float32), (0, 2, 3, 1))
    xpad = jnp.pad(x_nhwc, ((0, 0), (pad, pad), (pad, pad), (0, 0)), mode="reflect")
    xpad_f = xpad.reshape(N, Hp, Wp * Cin)
    # xstack[n, h, :] = concat_i xpad_f[n, h+i, :]   (N, Hout, kh*Wp*Cin)
    xstack = jnp.concatenate([xpad_f[:, i:i + Hout, :] for i in range(kh)], axis=-1)

    # --- weight-only glue (tiny): banded block-Toeplitz matrix, taps stacked on K ---
    wt = jnp.transpose(weight.astype(jnp.float32), (2, 3, 1, 0))   # (kh, kw, Cin, Cout)
    p_idx = jnp.arange(Wp)
    w_idx = jnp.arange(Wout)
    j_idx = jnp.arange(kw)
    # ind[j, p, w] = 1 iff padded column p feeds output column w through tap j.
    ind = (p_idx[None, :, None] == (w_idx[None, None, :] + j_idx[:, None, None]))
    a_conv = jnp.einsum("jpw,ijcd->ipcwd", ind.astype(jnp.float32), wt)
    a_full = jnp.concatenate(
        [jnp.zeros((kh, Wp, Cin, Wout, Cin), jnp.float32), a_conv], axis=-1)
    # Fold identity passthrough of x into the center tap: padded column w+pad,
    # channel ci -> concat slot (w, ci).
    ind_c = (p_idx[:, None] == (w_idx[None, :] + pad)).astype(jnp.float32)  # (Wp, Wout)
    passthru = jnp.einsum("pw,cd->pcwd", ind_c, jnp.eye(Cin, dtype=jnp.float32))
    a_full = a_full.at[pad, :, :, :, :Cin].add(passthru)
    a_mat = a_full.reshape(kh * Wp * Cin, Wcat)                    # (K, Wcat)

    # Bias / conv-column mask rows (zero in passthrough columns).
    bias_row = jnp.concatenate(
        [jnp.zeros((Wout, Cin), jnp.float32),
         jnp.broadcast_to(bias.astype(jnp.float32), (Wout, Cout))],
        axis=-1).reshape(1, Wcat)
    mask_row = jnp.concatenate(
        [jnp.zeros((Wout, Cin), jnp.float32), jnp.ones((Wout, Cout), jnp.float32)],
        axis=-1).reshape(1, Wcat)

    if tile_h is None:
        tile_h = _pick_tile_h(Hout, per_row_bytes=4 * (K + Wcat))
    assert Hout % tile_h == 0, (Hout, tile_h)
    grid = (N, Hout // tile_h)

    # VMEM guard: double-buffered streamed blocks + constant operands + slack.
    vmem_needed = (2 * 4 * tile_h * (K + Wcat)          # in/out blocks, 2 buffers each
                   + 2 * 4 * (K * Wcat + 2 * Wcat)      # a_mat, bias, mask buffers
                   + (2 << 20))
    vmem_limit = int(min(64 << 20, max(32 << 20, vmem_needed)))

    y = pl.pallas_call(
        _dense_conv_kernel,
        out_shape=jax.ShapeDtypeStruct((N, Hout, Wcat), jnp.float32),
        grid_spec=pltpu.PrefetchScalarGridSpec(
            num_scalar_prefetch=0,
            grid=grid,
            in_specs=[
                pl.BlockSpec((1, tile_h, K), lambda n, hb: (n, hb, 0)),
                # Constant-index operands: fetched once, never re-DMA'd.
                pl.BlockSpec((K, Wcat), lambda n, hb: (0, 0)),
                pl.BlockSpec((1, Wcat), lambda n, hb: (0, 0)),
                pl.BlockSpec((1, Wcat), lambda n, hb: (0, 0)),
            ],
            out_specs=pl.BlockSpec((1, tile_h, Wcat), lambda n, hb: (n, hb, 0)),
        ),
        compiler_params=pltpu.CompilerParams(
            dimension_semantics=("parallel", "arbitrary"),
            vmem_limit_bytes=vmem_limit),
    )(xstack, a_mat, bias_row, mask_row)

    # --- output glue: one free reshape + a single NHWC -> NCHW transpose -----
    return jnp.transpose(y.reshape(N, Hout, Wout, Ccat), (0, 3, 1, 2))


# ------------------------------- Reference --------------------------------- #
def _reference(x_nchw, weight, bias, *, kernel_size, stride):
    pad = kernel_size // 2
    xp = jnp.pad(x_nchw, ((0, 0), (0, 0), (pad, pad), (pad, pad)), mode="reflect")
    conv = jax.lax.conv_general_dilated(
        xp.astype(jnp.float32), weight.astype(jnp.float32),
        window_strides=(stride, stride), padding="VALID",
        dimension_numbers=("NCHW", "OIHW", "NCHW"))
    conv = jax.nn.relu(conv + bias.reshape(1, -1, 1, 1))
    return jnp.concatenate([x_nchw.astype(jnp.float32), conv], axis=1)


# --------------------------------- Main ------------------------------------ #
if __name__ == "__main__":
    in_channels, out_channels, kernel_size, stride = 4, 8, 3, 1
    N, H, W = 2, 16, 16

    key = jax.random.PRNGKey(0)
    kx, kw_, kb = jax.random.split(key, 3)

    x = jax.random.normal(kx, (N, in_channels, H, W), dtype=jnp.float32)
    fan_in = in_channels * kernel_size * kernel_size
    bound = 1.0 / (fan_in ** 0.5)
    weight = jax.random.uniform(
        kw_, (out_channels, in_channels, kernel_size, kernel_size),
        minval=-bound, maxval=bound, dtype=jnp.float32)
    bias = jax.random.uniform(kb, (out_channels,), minval=-bound, maxval=bound,
                              dtype=jnp.float32)

    fwd = jax.jit(functools.partial(dense_conv2d_forward,
                                    kernel_size=kernel_size, stride=stride))
    out = fwd(x, weight, bias)
    out = jax.block_until_ready(out)

    ref = _reference(x, weight, bias, kernel_size=kernel_size, stride=stride)
    assert out.shape == (N, in_channels + out_channels, H, W), out.shape
    assert jnp.allclose(out, ref, atol=1e-4, rtol=1e-4), \
        float(jnp.max(jnp.abs(out - ref)))

    print("KERNEL_OK")
</pallas_src>

<mosaic_0001>
module attributes {stable_mosaic.version = 11 : i64} {
  func.func @_dense_conv_kernel(%arg0: i32, %arg1: i32, %arg2: memref<1x16x216xf32, #tpu.memory_space<vmem>>, %arg3: memref<216x192xf32, #tpu.memory_space<vmem>>, %arg4: memref<1x192xf32, #tpu.memory_space<vmem>>, %arg5: memref<1x192xf32, #tpu.memory_space<vmem>>, %arg6: memref<1x16x192xf32, #tpu.memory_space<vmem>>) attributes {dimension_semantics = [#tpu.dimension_semantics<parallel>, #tpu.dimension_semantics<arbitrary>], iteration_bounds = array<i64: 2, 1>, scalar_prefetch = 0 : i64, scratch_operands = 0 : i64, tpu.core_type = #tpu.core_type<tc>, window_params = [{transform_indices = @transform_0, window_bounds = array<i64: 1, 16, 216>}, {pipeline_mode = #tpu.pipeline_mode<synchronous>, transform_indices = @transform_1, window_bounds = array<i64: 216, 192>}, {pipeline_mode = #tpu.pipeline_mode<synchronous>, transform_indices = @transform_2, window_bounds = array<i64: 1, 192>}, {pipeline_mode = #tpu.pipeline_mode<synchronous>, transform_indices = @transform_3, window_bounds = array<i64: 1, 192>}, {transform_indices = @transform_4, window_bounds = array<i64: 1, 16, 192>}]} {
    %c0 = arith.constant 0 : index
    %c0_0 = arith.constant 0 : index
    %c0_1 = arith.constant 0 : index
    %0 = vector.load %arg2[%c0, %c0_0, %c0_1] : memref<1x16x216xf32, #tpu.memory_space<vmem>>, vector<1x16x216xf32>
    %1 = vector.shape_cast %0 : vector<1x16x216xf32> to vector<16x216xf32>
    %c0_2 = arith.constant 0 : index
    %c0_3 = arith.constant 0 : index
    %2 = vector.load %arg3[%c0_2, %c0_3] : memref<216x192xf32, #tpu.memory_space<vmem>>, vector<216x192xf32>
    %cst = arith.constant dense<0.000000e+00> : vector<16x192xf32>
    %3 = tpu.matmul %1, %2, %cst {dimension_numbers = #tpu.dot_dimension_numbers<[1], [0], [0], [1], [0, 0, 1, 1], [], []>} : vector<16x216xf32>, vector<216x192xf32>, vector<16x192xf32> -> vector<16x192xf32>
    %c0_4 = arith.constant 0 : index
    %c0_5 = arith.constant 0 : index
    %4 = vector.load %arg4[%c0_4, %c0_5] : memref<1x192xf32, #tpu.memory_space<vmem>>, vector<1x192xf32>
    %5 = vector.broadcast %4 : vector<1x192xf32> to vector<16x192xf32>
    %6 = arith.addf %3, %5 : vector<16x192xf32>
    %cst_6 = arith.constant 0.000000e+00 : f32
    %7 = vector.broadcast %cst_6 : f32 to vector<16x192xf32>
    %8 = arith.maximumf %6, %7 : vector<16x192xf32>
    %c0_7 = arith.constant 0 : index
    %c0_8 = arith.constant 0 : index
    %9 = vector.load %arg5[%c0_7, %c0_8] : memref<1x192xf32, #tpu.memory_space<vmem>>, vector<1x192xf32>
    %cst_9 = arith.constant 5.000000e-01 : f32
    %10 = vector.broadcast %cst_9 : f32 to vector<1x192xf32>
    %11 = arith.cmpf ogt, %9, %10 : vector<1x192xf32>
    %12 = vector.shape_cast %11 : vector<1x192xi1> to vector<1x192xi1>
    %13 = vector.broadcast %12 : vector<1x192xi1> to vector<16x192xi1>
    %14 = arith.select %13, %8, %3 : vector<16x192xi1>, vector<16x192xf32>
    %c0_10 = arith.constant 0 : index
    %c0_11 = arith.constant 0 : index
    %c0_12 = arith.constant 0 : index
    %15 = vector.load %arg6[%c0_10, %c0_11, %c0_12] : memref<1x16x192xf32, #tpu.memory_space<vmem>>, vector<1x16x192xf32>
    %16 = vector.shape_cast %15 : vector<1x16x192xf32> to vector<16x192xf32>
    %17 = vector.shape_cast %14 : vector<16x192xf32> to vector<1x16x192xf32>
    tpu.vector_store %arg6[%c0_10, %c0_11, %c0_12], %17 {strides = array<i32>} : memref<1x16x192xf32, #tpu.memory_space<vmem>>, vector<1x16x192xf32>,
    return
  }
  func.func @transform_0(%arg0: i32, %arg1: i32) -> (i32, i32, i32) {
    %c0_i32 = arith.constant 0 : i32
    %c0_i32_0 = arith.constant 0 : i32
    return %arg0, %arg1, %c0_i32 : i32, i32, i32
  }
  func.func @transform_1(%arg0: i32, %arg1: i32) -> (i32, i32) {
    %c0_i32 = arith.constant 0 : i32
    %c0_i32_0 = arith.constant 0 : i32
    %c0_i32_1 = arith.constant 0 : i32
    return %c0_i32, %c0_i32_0 : i32, i32
  }
  func.func @transform_2(%arg0: i32, %arg1: i32) -> (i32, i32) {
    %c0_i32 = arith.constant 0 : i32
    %c0_i32_0 = arith.constant 0 : i32
    %c0_i32_1 = arith.constant 0 : i32
    return %c0_i32, %c0_i32_0 : i32, i32
  }
  func.func @transform_3(%arg0: i32, %arg1: i32) -> (i32, i32) {
    %c0_i32 = arith.constant 0 : i32
    %c0_i32_0 = arith.constant 0 : i32
    %c0_i32_1 = arith.constant 0 : i32
    return %c0_i32, %c0_i32_0 : i32, i32
  }
  func.func @transform_4(%arg0: i32, %arg1: i32) -> (i32, i32, i32) {
    %c0_i32 = arith.constant 0 : i32
    %c0_i32_0 = arith.constant 0 : i32
    return %arg0, %arg1, %c0_i32 : i32, i32, i32
  }
}

</mosaic_0001>

<bundles_post_ra>
// kernel: dense_conv2d_forward.1
= control target key start
LH: loop header
LB: loop body
LE: loop exit
PB: predicated region body
PF: predicated region fallthrough
CT: control target
= control target key end

     0   :  { %s617_s15 = smov 0   ;;  %s619_s16 = smov 0   ;;  %s849_s0 = inlined_call_operand.vmem [shape: f32[2,16,216], index: 0, kind: input, shape index: {}]   ;;  %s850_s1 = inlined_call_operand.vmem [shape: f32[216,192], index: 1, kind: input, shape index: {}]   ;;  %s851_s2 = inlined_call_operand.vmem [shape: f32[1,192], index: 2, kind: input, shape index: {}]   ;;  %s852_s3 = inlined_call_operand.vmem [shape: f32[1,192], index: 3, kind: input, shape index: {}]   ;;  %s853_s4 = inlined_call_operand.vmem [shape: f32[2,16,192], index: 4, kind: output, shape index: {}]  }
   0x1   :  { %s621_s17 = smov 0  }
   0x2 LB: > { %s26_s18 = sadd.s32 1, %s585_s16  ;;  %p529_p0 = scmp.ge.s32.totalorder %s589_s17, 1  ;;  %s589_s17 = sphi %s621_s17, %s14_s17   ;;  %s585_s16 = sphi %s619_s16, %s857_s16   ;;  %s581_s15 = sphi %s617_s15, %s856_s15  }
   0x3   : > { %p28_p1 = scmp.ge.s32.totalorder %s26_s18, 2  ;;  %p184_p2 = scmp.lt.s32.totalorder %s589_s17, 3 }
   0x5   : > { %s859_s18 = smov (%p28_p1, %s26_s18), 0  ;;  %p185_p3 = pnand %p529_p0, %p184_p2 }
   0x6   : > { %p221_p4 = scmp.lt.s32.totalorder (!%p185_p3), %s581_s15, 1 }
   0x7   : > { %188 = sbr.rel (%p185_p3) target bundleno = 192 (0xc0), region = 36 }
   0xc   : > { %v277_v0 = vld [vmem:[%s850_s1 + $0xf8] sm:$0xff]  ;;  %v276_v1 = vld [vmem:[%s850_s1 + $0xf0] sm:$0xff]  ;;  %v275_v2 = vld [vmem:[%s850_s1 + $0xe8] sm:$0xff]  ;;  %s861_s15 = smov (!%p221_p4, %s581_s15), 1  ;;  %vm300_vm0 = vcmask 719872   ;;  %v591_v61 = vmov 0  }
   0xd   : > { %353 = vmatpush.msra.mxu2 %v277_v0  ;;  %307 = vmatpush.msra.mxu0 %v276_v1  ;;  %v274_v3 = vld [vmem:[%s850_s1 + $0xe0] sm:$0xff]  ;;  %v273_v4 = vld [vmem:[%s850_s1 + $0xd8] sm:$0xff]  ;;  %v272_v5 = vld [vmem:[%s850_s1 + $0xd0] sm:$0xff]  ;;  %s540_s27 = sshll.u32 %s861_s15, 5  ;;  %vm425_vm4 = vcmask 523264  }
   0xe   : > { %v299_v6 = vld [vmem:[%s850_s1 + $0x1a8] sm:$0xff]  ;;  %v270_v8 = vld [vmem:[%s850_s1 + $0xc0] sm:$0xff]  ;;  %v297_v10 = vld [vmem:[%s850_s1 + $0x198] sm:$0xff]  ;;  %s778_s20 = scalar_lea.vmem %s849_s0, %s540_s27  ;;  %s240_s29 = scalar_lea.vmem %s853_s4, %s540_s27 }
   0xf   : > { %354 = vmatpush.msra.mxu2 %v275_v2  ;;  %308 = vmatpush.msra.mxu0 %v274_v3  ;;  %v271_v7 = vld [vmem:[%s850_s1 + $0xc8] sm:$0xff]  ;;  %v298_v9 = vld [vmem:[%s850_s1 + $0x1a0] sm:$0xff]  ;;  %v296_v11 = vld [vmem:[%s850_s1 + $0x190] sm:$0xff] }
  0x10   : > { %381 = vmatpush.msra.mxu3 %v299_v6  ;;  %v269_v12 = vld [vmem:[%s850_s1 + $0xb8] sm:$0xff]  ;;  %v268_v13 = vld [vmem:[%s850_s1 + $0xb0] sm:$0xff]  ;;  %335 = vmatpush.msra.mxu1 %v298_v9  ;;  %v295_v14 = vld [vmem:[%s850_s1 + $0x188] sm:$0xff] }
  0x11   : > { %355 = vmatpush.msra.mxu2 %v273_v4  ;;  %309 = vmatpush.msra.mxu0 %v272_v5  ;;  %v294_v15 = vld [vmem:[%s850_s1 + $0x180] sm:$0xff]  ;;  %v293_v16 = vld [vmem:[%s850_s1 + $0x178] sm:$0xff]  ;;  %v267_v17 = vld [vmem:[%s850_s1 + $0xa8] sm:$0xff] }
  0x12   : > { %382 = vmatpush.msra.mxu3 %v297_v10  ;;  %v266_v18 = vld [vmem:[%s850_s1 + $0xa0] sm:$0xff]  ;;  %336 = vmatpush.msra.mxu1 %v296_v11  ;;  %v292_v19 = vld [vmem:[%s850_s1 + $0x170] sm:$0xff]  ;;  %v291_v20 = vld [vmem:[%s850_s1 + $0x168] sm:$0xff] }
  0x13   : > { %356 = vmatpush.msra.mxu2 %v271_v7  ;;  %310 = vmatpush.msra.mxu0 %v270_v8  ;;  %v265_v21 = vld [vmem:[%s850_s1 + $0x98] sm:$0xff]  ;;  %v264_v22 = vld [vmem:[%s850_s1 + $0x90] sm:$0xff]  ;;  %v290_v23 = vld [vmem:[%s850_s1 + $0x160] sm:$0xff] }
  0x14   : > { %383 = vmatpush.msra.mxu3 %v295_v14  ;;  %337 = vmatpush.msra.mxu1 %v294_v15  ;;  %v289_v24 = vld [vmem:[%s850_s1 + $0x158] sm:$0xff]  ;;  %v263_v25 = vld [vmem:[%s850_s1 + $0x88] sm:$0xff]  ;;  %v262_v26 = vld [vmem:[%s850_s1 + $0x80] sm:$0xff] }
  0x15   : > { %357 = vmatpush.msra.mxu2 %v269_v12  ;;  %311 = vmatpush.msra.mxu0 %v268_v13  ;;  %v288_v27 = vld [vmem:[%s850_s1 + $0x150] sm:$0xff]  ;;  %v287_v28 = vld [vmem:[%s850_s1 + $0x148] sm:$0xff]  ;;  %v261_v29 = vld [vmem:[%s850_s1 + $0x78] sm:$0xff] }
  0x16   : > { %384 = vmatpush.msra.mxu3 %v293_v16  ;;  %338 = vmatpush.msra.mxu1 %v292_v19  ;;  %v260_v30 = vld [vmem:[%s850_s1 + $0x70] sm:$0xff]  ;;  %v286_v31 = vld [vmem:[%s850_s1 + $0x140] sm:$0xff]  ;;  %v285_v32 = vld [vmem:[%s850_s1 + $0x138] sm:$0xff] }
  0x17   : > { %358 = vmatpush.msra.mxu2 %v267_v17  ;;  %312 = vmatpush.msra.mxu0 %v266_v18  ;;  %v259_v33 = vld [vmem:[%s850_s1 + $0x68] sm:$0xff]  ;;  %v258_v34 = vld [vmem:[%s850_s1 + $0x60] sm:$0xff]  ;;  %v284_v35 = vld [vmem:[%s850_s1 + $0x130] sm:$0xff] }
  0x18   : > { %385 = vmatpush.msra.mxu3 %v291_v20  ;;  %339 = vmatpush.msra.mxu1 %v290_v23  ;;  %v283_v36 = vld [vmem:[%s850_s1 + $0x128] sm:$0xff]  ;;  %v257_v37 = vld [vmem:[%s850_s1 + $0x58] sm:$0xff]  ;;  %v256_v38 = vld [vmem:[%s850_s1 + $0x50] sm:$0xff] }
  0x19   : > { %359 = vmatpush.msra.mxu2 %v265_v21  ;;  %313 = vmatpush.msra.mxu0 %v264_v22  ;;  %v282_v39 = vld [vmem:[%s850_s1 + $0x120] sm:$0xff]  ;;  %v281_v40 = vld [vmem:[%s850_s1 + $0x118] sm:$0xff]  ;;  %v255_v41 = vld [vmem:[%s850_s1 + $0x48] sm:$0xff] }
  0x1a   : > { %386 = vmatpush.msra.mxu3 %v289_v24  ;;  %340 = vmatpush.msra.mxu1 %v288_v27  ;;  %v254_v42 = vld [vmem:[%s850_s1 + $0x40] sm:$0xff]  ;;  %v280_v43 = vld [vmem:[%s850_s1 + $0x110] sm:$0xff]  ;;  %v279_v44 = vld [vmem:[%s850_s1 + $0x108] sm:$0xff] }
  0x1b   : > { %360 = vmatpush.msra.mxu2 %v263_v25  ;;  %314 = vmatpush.msra.mxu0 %v262_v26  ;;  %v253_v45 = vld [vmem:[%s850_s1 + $0x38] sm:$0xff]  ;;  %v252_v46 = vld [vmem:[%s850_s1 + $0x30] sm:$0xff]  ;;  %v243_v47 = vld [vmem:[%s778_s20 + $0x8] sm:$0xff] }
  0x1c   : > { %387 = vmatpush.msra.mxu3 %v287_v28  ;;  %341 = vmatpush.msra.mxu1 %v286_v31  ;;  %v278_v48 = vld [vmem:[%s850_s1 + $0x100] sm:$0xff]  ;;  %v251_v49 = vld [vmem:[%s850_s1 + $0x28] sm:$0xff]  ;;  %v249_v51 = vld [vmem:[%s850_s1 + $0x18] sm:$0xff] }
  0x1d   : > { %361 = vmatpush.msra.mxu2 %v261_v29  ;;  %315 = vmatpush.msra.mxu0 %v260_v30  ;;  %v250_v50 = vld [vmem:[%s850_s1 + $0x20] sm:$0xff]  ;;  %v248_v52 = vld [vmem:[%s850_s1 + $0x10] sm:$0xff]  ;;  %v247_v53 = vld [vmem:[%s850_s1 + $0x8] sm:$0xff] }
  0x1e   : > { %388 = vmatpush.msra.mxu3 %v285_v32  ;;  %342 = vmatpush.msra.mxu1 %v284_v35  ;;  %v246_v54 = vld [vmem:[%s850_s1] sm:$0xff]  ;;  %v245_v56 = vld [vmem:[%s778_s20 + $0x18] sm:$0xff]  ;;  %v244_v57 = vld [vmem:[%s778_s20 + $0x10] sm:$0xff] }
  0x1f   : > { %362 = vmatpush.msra.mxu2 %v259_v33  ;;  %316 = vmatpush.msra.mxu0 %v258_v34  ;;  %v242_v55 = vld [vmem:[%s778_s20] sm:$0xff] }
  0x20   : > { %389 = vmatpush.msra.mxu3 %v283_v36  ;;  %343 = vmatpush.msra.mxu1 %v282_v39  ;;  %v413_v58 = vld [vmem:[%s852_s3] sm:$0x3] }
  0x21   : > { %363 = vmatpush.msra.mxu2 %v257_v37  ;;  %317 = vmatpush.msra.mxu0 %v256_v38  ;;  %vm414_vm1 = vcmp.gt.f32.partialorder %v413_v58, 0.5  ;;  %v399_v60 = vld [vmem:[%s851_s2] sm:$0x3] }
  0x22   : > { %390 = vmatpush.msra.mxu3 %v281_v40  ;;  %344 = vmatpush.msra.mxu1 %v280_v43  ;;  %v415_v62 = vsel %vm414_vm1, 1, %v591_v61  ;;  %v401_v63 = vperm.slane %v399_v60, 0  ;;  %v402_v7 = vperm.slane %v399_v60, 1 }
  0x23   : > { %364 = vmatpush.msra.mxu2 %v255_v41  ;;  %318 = vmatpush.msra.mxu0 %v254_v42  ;;  %v416_v1 = vperm.slane %v415_v62, 0  ;;  %v417_v9 = vperm.slane %v415_v62, 1 }
  0x24   : > { %391 = vmatpush.msra.mxu3 %v279_v44  ;;  %345 = vmatpush.msra.mxu1 %v278_v48 }
  0x25   : > { %365 = vmatpush.msra.mxu2 %v253_v45  ;;  %319 = vmatpush.msra.mxu0 %v252_v46  ;;  %vm827_vm2 = vcmp.eq.s32.totalorder %v416_v1, 1  ;;  %vm419_vm3 = vcmp.eq.s32.totalorder %v417_v9, 1 }
  0x26   : > { %536 = vmatmul.msk.f32.vlgmr.msra.gmra.mxu3 %vm300_vm0, %v243_v47  ;;  %534 = vmatmul.msk.f32.vlgmr.msra.gmra.mxu1 %vm300_vm0, %v243_v47 }
  0x27   : > { %366 = vmatpush.msra.mxu2 %v251_v49  ;;  %320 = vmatpush.msra.mxu0 %v250_v50 }
  0x29   : > { %367 = vmatpush.msra.mxu2 %v249_v51  ;;  %321 = vmatpush.msra.mxu0 %v248_v52 }
  0x2b   : > { %368 = vmatpush.msra.mxu2 %v247_v53  ;;  %322 = vmatpush.msra.mxu0 %v246_v54 }
  0x2c   : > { %369 = vmatmul.f32.vlgmr.msra.gmra.mxu2 %v242_v55  ;;  %323 = vmatmul.f32.vlgmr.msra.gmra.mxu0 %v242_v55 }
  0x2e   : > { %537 = vmatmul.msk.f32.gmra.mxu3 %vm300_vm0, %v245_v56  ;;  %535 = vmatmul.msk.f32.gmra.mxu1 %vm300_vm0, %v245_v56 }
  0x34   : > { %372 = vmatmul.f32.gmra.mxu2 %v244_v57  ;;  %326 = vmatmul.f32.gmra.mxu0 %v244_v57 }
  0xa3   : > { %v347_v59 = vpop.f32.mrf.mxu1 }
  0xa9   : > { %v324_v0 = vpop.f32.mrf.mxu0  ;;  %v393_v3 = vpop.f32.mrf.mxu3 }
  0xaa   : > { %v348_v2 = vadd.f32 %v347_v59, %v324_v0 }
  0xab   : > { %v350_v10 = vpop.f32.mrf.mxu1 }
  0xac   : > { %v405_v4 = vadd.f32 %v401_v63, %v348_v2 }
  0xae   : > { %v409_v6 = vmax.f32 %v405_v4, 0.0 }
  0xaf   : > { %v370_v8 = vpop.f32.mrf.mxu2 }
  0xb0   : > { %v420_v11 = vsel %vm827_vm2, %v409_v6, %v348_v2  ;;  %v394_v12 = vadd.f32 %v393_v3, %v370_v8 }
  0xb1   : > { %424 = vst [vmem:[%s240_s29] sm:$0xff] %v420_v11  ;;  %v327_v13 = vpop.f32.mrf.mxu0  ;;  %v396_v18 = vpop.f32.mrf.mxu3 }
  0xb2   : > { %v406_v14 = vadd.f32 %v402_v7, %v394_v12  ;;  %v351_v15 = vadd.f32 %v350_v10, %v327_v13 }
  0xb4   : > { %v410_v16 = vmax.f32 %v406_v14, 0.0  ;;  %v407_v17 = vadd.f32 %v401_v63, %v351_v15 }
  0xb6   : > { %v421_v19 = vsel %vm419_vm3, %v410_v16, %v394_v12  ;;  %v411_v20 = vmax.f32 %v407_v17, 0.0 }
  0xb7   : > { %426 = vst.msk [vmem:[%s240_s29 + $0x8] sm:$0xff] %vm425_vm4, %v421_v19  ;;  %v373_v21 = vpop.f32.mrf.mxu2 }
  0xb8   : > { %v422_v22 = vsel %vm827_vm2, %v411_v20, %v351_v15  ;;  %v397_v23 = vadd.f32 %v396_v18, %v373_v21 }
  0xb9   : > { %427 = vst [vmem:[%s240_s29 + $0x10] sm:$0xff] %v422_v22 }
  0xba   : > { %v408_v24 = vadd.f32 %v402_v7, %v397_v23 }
  0xbc   : > { %v412_v25 = vmax.f32 %v408_v24, 0.0 }
  0xbe   : > { %v423_v26 = vsel %vm419_vm3, %v412_v25, %v397_v23 }
  0xbf   : > { %428 = vst.msk [vmem:[%s240_s29 + $0x18] sm:$0xff] %vm425_vm4, %v423_v26 }
  0xc0 PF: > { %s14_s17 = sadd.s32 1, %s589_s17   ;;  %s856_s15 = smov %s585_s16 }
  0xc1   : > { %p11_p5 = scmp.ge.s32.totalorder %s14_s17, 4   ;;  %s857_s16 = smov %s859_s18 }
  0xc3   :  { %13 = sbr.rel (!%p11_p5) target bundleno = 2 (0x2), region = 66 }

</bundles_post_ra>
